<compile_context>
chip_gen: v6e
topology: v6e:2x2x1
jax: 0.10.0
libtpu: 0.0.40
codegen_flags: <defaults>
</compile_context>

<pallas_src>
import functools

import jax
import jax.numpy as jnp
from jax.experimental import pallas as pl
from jax.experimental.pallas import tpu as pltpu

DROPOUT_P = 0.2
KEEP_PROB = 1.0 - DROPOUT_P
# Compare on the low 24 random bits of the hash (keep-prob quantization < 1e-7).
_KEEP_THRESHOLD_24 = int(round(KEEP_PROB * (1 << 24)))

# Default row tile for the HBM-streaming regime (multiple of 8; small enough
# for v7x's 64 MiB VMEM / v5e's 16 MiB scoped default even at H=1024).
_MAX_TILE_ROWS = 512


def _dropout_keep_mask(shape, row_offset, seed):
    """Bernoulli(KEEP_PROB) keep mask from a stateless hash of the absolute
    element index and the seed.  Pure jnp ops (iota / xor / mul / shift /
    compare) so it lowers on TPU and also runs in interpret mode."""
    rows = jax.lax.broadcasted_iota(jnp.uint32, shape, 0)
    cols = jax.lax.broadcasted_iota(jnp.uint32, shape, 1)
    idx = (rows + row_offset.astype(jnp.uint32)) * jnp.uint32(shape[1]) + cols
    x = idx + seed.astype(jnp.uint32) * jnp.uint32(0x9E3779B9)
    # splitmix32-style finalizer
    x = x ^ (x >> jnp.uint32(16))
    x = x * jnp.uint32(0x7FEB352D)
    x = x ^ (x >> jnp.uint32(15))
    x = x * jnp.uint32(0x846CA68B)
    x = x ^ (x >> jnp.uint32(16))
    r24 = (x & jnp.uint32(0x00FFFFFF)).astype(jnp.int32)
    return r24 < jnp.int32(_KEEP_THRESHOLD_24)


def _qa_kernel_train(seed_ref, x_ref, w_ref, b_ref, o_ref):
    """Dropout (mask only; 1/(1-p) already folded into w) + Linear.

    seed_ref: SMEM (1,) int32   -- dropout PRNG seed
    x_ref:    VMEM (tile_n, H)  -- row tile of flattened hidden states
    w_ref:    VMEM (H, 3)       -- classifier weight^T, pre-scaled by 1/(1-p)
    b_ref:    VMEM (1, 3)       -- classifier bias
    o_ref:    VMEM (tile_n, 3)  -- logits tile
    """
    tile_rows, h = x_ref.shape
    row_off = pl.program_id(0) * tile_rows      # absolute row offset of this tile
    keep = _dropout_keep_mask((tile_rows, h), row_off, seed_ref[0])
    x = jnp.where(keep, x_ref[...], 0.0)
    o_ref[...] = (
        jnp.dot(x, w_ref[...], preferred_element_type=jnp.float32) + b_ref[...]
    )


def _qa_kernel_eval(x_ref, w_ref, b_ref, o_ref):
    """Eval-mode path (dropout is identity)."""
    o_ref[...] = (
        jnp.dot(x_ref[...], w_ref[...], preferred_element_type=jnp.float32)
        + b_ref[...]
    )


def _row_tile(n):
    # Full array if small (always a legal block), otherwise a 512-row tile
    # (multiple of 8) so BlockSpec auto-pipelining can double-buffer the DMA.
    return n if n <= _MAX_TILE_ROWS else _MAX_TILE_ROWS


@functools.partial(jax.jit, static_argnames=("training",))
def question_answering_forward(hidden_states, weight, bias, seed, *, training=True):
    """hidden_states: (B, S, H) float32
       weight:        (3, H)    float32   (PyTorch Linear layout)
       bias:          (3,)      float32
       seed:          ()        int32     (dropout PRNG seed, training only)
    """
    B, S, H = hidden_states.shape
    N = B * S
    x2d = hidden_states.reshape(N, H)
    b2d = bias.reshape(1, 3).astype(jnp.float32)

    tile_n = _row_tile(N)
    grid = (pl.cdiv(N, tile_n),)

    cost = pl.CostEstimate(
        flops=2 * N * H * 3,
        bytes_accessed=N * H * 4 + N * 3 * 4 + H * 3 * 4 + 3 * 4,
        transcendentals=0,
    )
    cparams = pltpu.CompilerParams(dimension_semantics=("parallel",))
    out_shape = jax.ShapeDtypeStruct((N, 3), jnp.float32)

    x_spec = pl.BlockSpec((tile_n, H), lambda i: (i, 0))
    w_spec = pl.BlockSpec((H, 3), lambda i: (0, 0))
    b_spec = pl.BlockSpec((1, 3), lambda i: (0, 0))
    o_spec = pl.BlockSpec((tile_n, 3), lambda i: (i, 0))

    if training:
        # Fold the inverted-dropout 1/(1-p) scale into the tiny weight once.
        w_scaled = (weight.T * jnp.float32(1.0 / KEEP_PROB)).astype(jnp.float32)
        seed_arr = jnp.asarray(seed, jnp.int32).reshape(1)
        logits2d = pl.pallas_call(
            _qa_kernel_train,
            out_shape=out_shape,
            grid=grid,
            in_specs=[
                pl.BlockSpec(memory_space=pltpu.MemorySpace.SMEM),   # seed
                x_spec,                                              # x rows
                w_spec,                                              # w^T (scaled)
                b_spec,                                              # bias
            ],
            out_specs=o_spec,
            compiler_params=cparams,
            cost_estimate=cost,
        )(seed_arr, x2d, w_scaled, b2d)
    else:
        w_t = weight.T.astype(jnp.float32)
        logits2d = pl.pallas_call(
            _qa_kernel_eval,
            out_shape=out_shape,
            grid=grid,
            in_specs=[x_spec, w_spec, b_spec],
            out_specs=o_spec,
            compiler_params=cparams,
            cost_estimate=cost,
        )(x2d, w_t, b2d)

    return logits2d.reshape(B, S, 3)


def init_params(key, hidden):
    """Deterministic init matching torch.nn.Linear(hidden, 3) default
    (uniform in +/- 1/sqrt(hidden) for both weight and bias)."""
    kw, kb = jax.random.split(key)
    bound = 1.0 / jnp.sqrt(jnp.float32(hidden))
    weight = jax.random.uniform(kw, (3, hidden), jnp.float32, -bound, bound)
    bias = jax.random.uniform(kb, (3,), jnp.float32, -bound, bound)
    return weight, bias


if __name__ == "__main__":
    key = jax.random.PRNGKey(0)
    k_x, k_p = jax.random.split(key)

    B, S, H = 2, 8, 32
    hidden_states = jax.random.normal(k_x, (B, S, H), jnp.float32)
    weight, bias = init_params(k_p, H)
    seed = 1234

    # Training-mode forward (dropout active, inverted-dropout scaling).
    logits_train = question_answering_forward(
        hidden_states, weight, bias, jnp.int32(seed), training=True
    )
    jax.block_until_ready(logits_train)

    # Eval-mode forward (dropout = identity).
    logits_eval = question_answering_forward(
        hidden_states, weight, bias, jnp.int32(seed), training=False
    )
    jax.block_until_ready(logits_eval)

    # Pure-JAX references.
    x2d = hidden_states.reshape(B * S, H)
    ref_eval = x2d @ weight.T + bias
    keep_ref = _dropout_keep_mask((B * S, H), jnp.int32(0), jnp.int32(seed))
    ref_train = (
        jnp.where(keep_ref, x2d, 0.0) @ (weight.T * (1.0 / KEEP_PROB)) + bias
    )

    assert logits_train.shape == (B, S, 3)
    assert logits_eval.shape == (B, S, 3)
    assert jnp.allclose(logits_eval.reshape(-1, 3), ref_eval, atol=1e-5)
    assert jnp.allclose(logits_train.reshape(-1, 3), ref_train, atol=1e-5)

    print("KERNEL_OK")
</pallas_src>

<mosaic_0001>
module attributes {stable_mosaic.version = 11 : i64} {
  func.func @_qa_kernel_train(%arg0: i32, %arg1: memref<1xi32, #tpu.memory_space<smem>>, %arg2: memref<16x32xf32, #tpu.memory_space<vmem>>, %arg3: memref<32x3xf32, #tpu.memory_space<vmem>>, %arg4: memref<1x3xf32, #tpu.memory_space<vmem>>, %arg5: memref<16x3xf32, #tpu.memory_space<vmem>>) attributes {dimension_semantics = [#tpu.dimension_semantics<parallel>], iteration_bounds = array<i64: 1>, scalar_prefetch = 0 : i64, scratch_operands = 0 : i64, tpu.core_type = #tpu.core_type<tc>, window_params = [{transform_indices = @transform_0, window_bounds = array<i64: 1>}, {transform_indices = @transform_1, window_bounds = array<i64: 16, 32>}, {pipeline_mode = #tpu.pipeline_mode<synchronous>, transform_indices = @transform_2, window_bounds = array<i64: 32, 3>}, {pipeline_mode = #tpu.pipeline_mode<synchronous>, transform_indices = @transform_3, window_bounds = array<i64: 1, 3>}, {transform_indices = @transform_4, window_bounds = array<i64: 16, 3>}]} {
    %c16_i32 = arith.constant 16 : i32
    %0 = arith.muli %arg0, %c16_i32 : i32
    %c0 = arith.constant 0 : index
    %1 = memref.load %arg1[%c0] : memref<1xi32, #tpu.memory_space<smem>>
    %2 = tpu.iota {dimensions = array<i32: 0>} : vector<16x32xi32>
    %3 = tpu.iota {dimensions = array<i32: 1>} : vector<16x32xi32>
    %4 = vector.broadcast %0 : i32 to vector<16x32xi32>
    %5 = arith.addi %2, %4 : vector<16x32xi32>
    %c32_i32 = arith.constant 32 : i32
    %6 = vector.broadcast %c32_i32 : i32 to vector<16x32xi32>
    %7 = arith.muli %5, %6 : vector<16x32xi32>
    %8 = arith.addi %7, %3 : vector<16x32xi32>
    %c-1640531527_i32 = arith.constant -1640531527 : i32
    %9 = arith.muli %1, %c-1640531527_i32 : i32
    %10 = vector.broadcast %9 : i32 to vector<16x32xi32>
    %11 = arith.addi %8, %10 : vector<16x32xi32>
    %c16_i32_0 = arith.constant 16 : i32
    %12 = vector.broadcast %c16_i32_0 : i32 to vector<16x32xi32>
    %13 = arith.shrui %11, %12 : vector<16x32xi32>
    %14 = arith.xori %11, %13 : vector<16x32xi32>
    %c2146121005_i32 = arith.constant 2146121005 : i32
    %15 = vector.broadcast %c2146121005_i32 : i32 to vector<16x32xi32>
    %16 = arith.muli %14, %15 : vector<16x32xi32>
    %c15_i32 = arith.constant 15 : i32
    %17 = vector.broadcast %c15_i32 : i32 to vector<16x32xi32>
    %18 = arith.shrui %16, %17 : vector<16x32xi32>
    %19 = arith.xori %16, %18 : vector<16x32xi32>
    %c-2073254261_i32 = arith.constant -2073254261 : i32
    %20 = vector.broadcast %c-2073254261_i32 : i32 to vector<16x32xi32>
    %21 = arith.muli %19, %20 : vector<16x32xi32>
    %c16_i32_1 = arith.constant 16 : i32
    %22 = vector.broadcast %c16_i32_1 : i32 to vector<16x32xi32>
    %23 = arith.shrui %21, %22 : vector<16x32xi32>
    %24 = arith.xori %21, %23 : vector<16x32xi32>
    %c16777215_i32 = arith.constant 16777215 : i32
    %25 = vector.broadcast %c16777215_i32 : i32 to vector<16x32xi32>
    %26 = arith.andi %24, %25 : vector<16x32xi32>
    %c13421773_i32 = arith.constant 13421773 : i32
    %27 = vector.broadcast %c13421773_i32 : i32 to vector<16x32xi32>
    %28 = arith.cmpi slt, %26, %27 : vector<16x32xi32>
    %c0_2 = arith.constant 0 : index
    %c0_3 = arith.constant 0 : index
    %29 = vector.load %arg2[%c0_2, %c0_3] : memref<16x32xf32, #tpu.memory_space<vmem>>, vector<16x32xf32>
    %cst = arith.constant 0.000000e+00 : f32
    %30 = vector.broadcast %cst : f32 to vector<16x32xf32>
    %31 = arith.select %28, %29, %30 : vector<16x32xi1>, vector<16x32xf32>
    %c0_4 = arith.constant 0 : index
    %c0_5 = arith.constant 0 : index
    %32 = vector.load %arg3[%c0_4, %c0_5] : memref<32x3xf32, #tpu.memory_space<vmem>>, vector<32x3xf32>
    %cst_6 = arith.constant dense<0.000000e+00> : vector<16x3xf32>
    %33 = tpu.matmul %31, %32, %cst_6 {dimension_numbers = #tpu.dot_dimension_numbers<[1], [0], [0], [1], [0, 0, 1, 1], [], []>} : vector<16x32xf32>, vector<32x3xf32>, vector<16x3xf32> -> vector<16x3xf32>
    %c0_7 = arith.constant 0 : index
    %c0_8 = arith.constant 0 : index
    %34 = vector.load %arg4[%c0_7, %c0_8] : memref<1x3xf32, #tpu.memory_space<vmem>>, vector<1x3xf32>
    %35 = vector.broadcast %34 : vector<1x3xf32> to vector<16x3xf32>
    %36 = arith.addf %33, %35 : vector<16x3xf32>
    %c0_9 = arith.constant 0 : index
    %c0_10 = arith.constant 0 : index
    %37 = vector.load %arg5[%c0_9, %c0_10] : memref<16x3xf32, #tpu.memory_space<vmem>>, vector<16x3xf32>
    tpu.vector_store %arg5[%c0_9, %c0_10], %36 {strides = array<i32>} : memref<16x3xf32, #tpu.memory_space<vmem>>, vector<16x3xf32>,
    return
  }
  func.func @transform_0(%arg0: i32) -> i32 {
    %c0_i32 = arith.constant 0 : i32
    %c0_i32_0 = arith.constant 0 : i32
    return %c0_i32 : i32
  }
  func.func @transform_1(%arg0: i32) -> (i32, i32) {
    %c0_i32 = arith.constant 0 : i32
    %c0_i32_0 = arith.constant 0 : i32
    return %arg0, %c0_i32 : i32, i32
  }
  func.func @transform_2(%arg0: i32) -> (i32, i32) {
    %c0_i32 = arith.constant 0 : i32
    %c0_i32_0 = arith.constant 0 : i32
    %c0_i32_1 = arith.constant 0 : i32
    return %c0_i32, %c0_i32_0 : i32, i32
  }
  func.func @transform_3(%arg0: i32) -> (i32, i32) {
    %c0_i32 = arith.constant 0 : i32
    %c0_i32_0 = arith.constant 0 : i32
    %c0_i32_1 = arith.constant 0 : i32
    return %c0_i32, %c0_i32_0 : i32, i32
  }
  func.func @transform_4(%arg0: i32) -> (i32, i32) {
    %c0_i32 = arith.constant 0 : i32
    %c0_i32_0 = arith.constant 0 : i32
    return %arg0, %c0_i32 : i32, i32
  }
}

</mosaic_0001>

<bundles_post_ra>
// kernel: question_answering_forward.1
= control target key start
LH: loop header
LB: loop body
LE: loop exit
PB: predicated region body
PF: predicated region fallthrough
CT: control target
= control target key end

     0   :  { %v20_v0 = vlaneseq  ;;  %vm71_vm0 = vcmask 261120   ;;  %vm153_vm3 = vcmask 23552   ;;  %s235_s2 = inlined_call_operand.vmem [shape: f32[32,3], index: 2, kind: input, shape index: {}]   ;;  %s236_s0 = inlined_call_operand.<no memory space> [shape: s32[1], index: 0, kind: input, shape index: {}]   ;;  %s237_s1 = inlined_call_operand.vmem [shape: f32[16,32], index: 1, kind: input, shape index: {}]   ;;  %s238_s3 = inlined_call_operand.vmem [shape: f32[1,3], index: 3, kind: input, shape index: {}]   ;;  %s239_s4 = inlined_call_operand.vmem [shape: f32[16,3], index: 4, kind: output, shape index: {}]  }
   0x1   :  { %v63_v1 = vld [vmem:[%s235_s2 + $0x18] sm:$0xff]  ;;  %v62_v2 = vld [vmem:[%s235_s2 + $0x10] sm:$0xff]  ;;  %s32_s21 = smul.u32 2654435769, %s236_s0  ;;  %v61_v5 = vld [vmem:[%s235_s2 + $0x8] sm:$0xff] }
   0x2   :  { %169 = vmatprep.subr.mxu0 %v63_v1  ;;  %v21_v3 = vshrl.u32 %v20_v0, 7  ;;  %v24_v4 = vand.u32 127, %v20_v0  ;;  %v60_v8 = vld [vmem:[%s235_s2] sm:$0xff]  ;;  %v57_v33 = vld [vmem:[%s237_s1 + $0x8] sm:$0xff] }
   0x3   :  { %170 = vmatpush3.msra.mxu0 %v63_v1  ;;  %v33_v9 = vstv %s32_s21  ;;  %v56_v31 = vld [vmem:[%s237_s1] sm:$0xff] }
   0x4   :  { %171 = vmatprep.subr.mxu0 %v62_v2  ;;  %v22_v6 = vadd.s32 8, %v21_v3  ;;  %v28_v7 = vmul.u32 32, %v21_v3  ;;  %v160_v37 = vld [vmem:[%s238_s3] ss:$0 sm:$0xff] }
   0x5   :  { %172 = vmatpush3.msra.mxu0 %v62_v2 }
   0x6   :  { %173 = vmatprep.subr.mxu0 %v61_v5  ;;  %v29_v10 = vmul.u32 32, %v22_v6  ;;  %v30_v11 = vadd.s32 %v28_v7, %v24_v4 }
   0x7   :  { %174 = vmatpush3.msra.mxu0 %v61_v5 }
   0x8   :  { %175 = vmatprep.subr.mxu0 %v60_v8  ;;  %v31_v12 = vadd.s32 %v29_v10, %v24_v4  ;;  %v34_v13 = vadd.s32 %v33_v9, %v30_v11 }
   0x9   :  { %176 = vmatpush3.msra.mxu0 %v60_v8 }
   0xa   :  { %v35_v14 = vadd.s32 %v33_v9, %v31_v12  ;;  %v36_v15 = vshrl.u32 %v34_v13, 16 }
   0xc   :  { %v38_v16 = vxor.u32 %v36_v15, %v34_v13  ;;  %v37_v17 = vshrl.u32 %v35_v14, 16 }
   0xe   :  { %v40_v18 = vmul.u32 2146121005, %v38_v16  ;;  %v39_v19 = vxor.u32 %v37_v17, %v35_v14 }
  0x10   :  { %v42_v20 = vshrl.u32 %v40_v18, 15  ;;  %v41_v21 = vmul.u32 2146121005, %v39_v19 }
  0x12   :  { %v44_v22 = vxor.u32 %v42_v20, %v40_v18  ;;  %v43_v23 = vshrl.u32 %v41_v21, 15 }
  0x14   :  { %v46_v24 = vmul.u32 2221713035, %v44_v22  ;;  %v45_v25 = vxor.u32 %v43_v23, %v41_v21 }
  0x16   :  { %v48_v26 = vshrl.u32 %v46_v24, 16  ;;  %v47_v27 = vmul.u32 2221713035, %v45_v25 }
  0x18   :  { %v50_v28 = vxor.u32 %v48_v26, %v46_v24  ;;  %v49_v29 = vshrl.u32 %v47_v27, 16 }
  0x1a   :  { %v52_v30 = vand.u32 16777215, %v50_v28  ;;  %v51_v32 = vxor.u32 %v49_v29, %v47_v27 }
  0x1c   :  { %vm54_vm1 = vcmp.lt.s32.totalorder %v52_v30, 13421773  ;;  %v53_v34 = vand.u32 16777215, %v51_v32 }
  0x1d   :  { %v58_v35 = vsel %vm54_vm1, %v56_v31, 0.0 }
  0x1e   :  { %177 = vmatprep.mubr.msk.f32.mxu0 %vm71_vm0, %v58_v35  ;;  %vm55_vm2 = vcmp.lt.s32.totalorder %v53_v34, 13421773 }
  0x1f   :  { %v59_v36 = vsel %vm55_vm2, %v57_v33, 0.0 }
  0x20   :  { %178 = vmatmul.mubr.msk.f32.vlgmr.msra.gmra.mxu0 %vm71_vm0, %v59_v36 }
  0xe0   :  { %v179_v38 = vpop.f32.mrf.mxu0 }
  0xe1   :  { %v150_v39 = vadd.f32 %v179_v38, %v160_v37 }
  0xe2   :  { %v144_v40 = vpop.f32.mrf.mxu0 }
  0xe3   :  { %155 = vst.msk [vmem:[%s239_s4 + $0x8] sm:$0xff] %vm153_vm3, %v150_v39  ;;  %v145_v41 = vadd.f32 %v160_v37, %v144_v40 }
  0xe5   :  { %154 = vst.msk [vmem:[%s239_s4] sm:$0xff] %vm153_vm3, %v145_v41 }

</bundles_post_ra>
